<compile_context>
chip_gen: v5e
topology: v5e:2x2
jax: 0.10.0
libtpu: 0.0.40
codegen_flags: <defaults>
</compile_context>

<pallas_src>
import jax
import jax.numpy as jnp
from jax.experimental import pallas as pl
from jax.experimental.pallas import tpu as pltpu

COMMON_DIM = 128   # fixed by the module
NUM_HEADS = 4      # fixed by the module (no effect on the output; see header note)

_MAX_TM = 1024           # max batch rows per grid step
_PALLAS_MIN_BATCH = 512  # below this, a plain XLA fusion matches the kernel


def _round_up(x, m):
    return ((x + m - 1) // m) * m


def _fused_kernel(hist_ref, clin_ref, a_h_ref, a_c_ref, c_h_ref, c_c_ref,
                  hist_out_ref, clin_out_ref):
    # One batch tile:
    #   hist_out = hist + clin @ A_h + c_h
    #   clin_out = clin + hist @ A_c + c_c
    # (Residual stays a VPU add: it comes from the *other* modality's matmul input,
    #  so it cannot be folded into A_h / A_c once the inputs are kept separate.)
    hist = hist_ref[...]
    clin = clin_ref[...]
    hist_out_ref[...] = (hist
                         + jnp.dot(clin, a_h_ref[...],
                                   preferred_element_type=jnp.float32)
                         + c_h_ref[...])
    clin_out_ref[...] = (clin
                         + jnp.dot(hist, a_c_ref[...],
                                   preferred_element_type=jnp.float32)
                         + c_c_ref[...])


def fold_params(params, histology_dim, clinical_dim):
    """Fold the affine chain once (outside the hot path) into (A_h, c_h, A_c, c_c)."""
    w_vo = params["W_v"].T @ params["W_o"].T                        # (128, 128)
    b_vo = params["b_v"] @ params["W_o"].T + params["b_o"]          # (128,)

    # hist_final = hist + clin @ A_h + c_h
    A_h = params["W_cp"].T @ w_vo @ params["W_ho"].T                # (Dc, Dh)
    c_h = (params["b_cp"] @ w_vo + b_vo) @ params["W_ho"].T + params["b_ho"]
    # clin_final = clin + hist @ A_c + c_c
    A_c = params["W_hp"].T @ w_vo @ params["W_co"].T                # (Dh, Dc)
    c_c = (params["b_hp"] @ w_vo + b_vo) @ params["W_co"].T + params["b_co"]

    return {
        "A_h": A_h.astype(jnp.float32),
        "A_c": A_c.astype(jnp.float32),
        "c_h": c_h.reshape(1, histology_dim).astype(jnp.float32),
        "c_c": c_c.reshape(1, clinical_dim).astype(jnp.float32),
        "Dh": histology_dim,
        "Dc": clinical_dim,
    }


def _choose_tile(B):
    """Batch rows per grid step: multiple of 8, <= _MAX_TM, >= 2 steps when B > 8."""
    if B <= 8:
        return 8
    n_tiles = max(2, pl.cdiv(B, _MAX_TM))        # >= 2 steps -> both v7x TensorCores
    return _round_up(pl.cdiv(B, n_tiles), 8)     # balanced tiles, bounded padding


def cross_modal_attention(hist, clin, folded, *, force_pallas=False):
    """hist: (B, Dh) f32, clin: (B, Dc) f32 -> (hist_final, clin_final)."""
    Dh, Dc = folded["Dh"], folded["Dc"]
    assert hist.shape[1] == Dh and clin.shape[1] == Dc
    B = hist.shape[0]

    if not force_pallas and B < _PALLAS_MIN_BATCH:
        # Tiny batch: a single-step pallas_call is pure launch + DMA-priming
        # overhead; let XLA fuse the identical folded affine map directly.
        hist_final = hist + clin @ folded["A_h"] + folded["c_h"]
        clin_final = clin + hist @ folded["A_c"] + folded["c_c"]
        return hist_final, clin_final

    TM = _choose_tile(B)
    grid = (pl.cdiv(B, TM),)   # final partial tile handled by Pallas boundary masking

    flops = 4 * B * Dh * Dc + 2 * B * (Dh + Dc)
    bytes_accessed = 4 * (2 * B * (Dh + Dc) + 2 * Dh * Dc + Dh + Dc)

    hist_final, clin_final = pl.pallas_call(
        _fused_kernel,
        out_shape=(jax.ShapeDtypeStruct((B, Dh), jnp.float32),
                   jax.ShapeDtypeStruct((B, Dc), jnp.float32)),
        grid=grid,
        in_specs=[
            pl.BlockSpec((TM, Dh), lambda i: (i, 0)),   # hist: tiled over batch
            pl.BlockSpec((TM, Dc), lambda i: (i, 0)),   # clin: tiled over batch
            pl.BlockSpec((Dc, Dh), lambda i: (0, 0)),   # A_h: resident
            pl.BlockSpec((Dh, Dc), lambda i: (0, 0)),   # A_c: resident
            pl.BlockSpec((1, Dh), lambda i: (0, 0)),    # c_h: resident
            pl.BlockSpec((1, Dc), lambda i: (0, 0)),    # c_c: resident
        ],
        out_specs=(pl.BlockSpec((TM, Dh), lambda i: (i, 0)),
                   pl.BlockSpec((TM, Dc), lambda i: (i, 0))),
        compiler_params=pltpu.CompilerParams(
            dimension_semantics=("parallel",)),          # v7x: shard batch over both TCs
        cost_estimate=pl.CostEstimate(flops=flops, transcendentals=0,
                                      bytes_accessed=bytes_accessed),
    )(hist, clin, folded["A_h"], folded["A_c"], folded["c_h"], folded["c_c"])

    return hist_final, clin_final


def _reference(hist, clin, p):
    """Pure-JAX reference mirroring the PyTorch forward exactly (seq_len == 1)."""
    hp = hist @ p["W_hp"].T + p["b_hp"]
    cp = clin @ p["W_cp"].T + p["b_cp"]
    # seq_len = 1 attention: softmax == 1 -> out = out_proj(v_proj(kv))
    hist_att = (cp @ p["W_v"].T + p["b_v"]) @ p["W_o"].T + p["b_o"]
    clin_att = (hp @ p["W_v"].T + p["b_v"]) @ p["W_o"].T + p["b_o"]
    hist_final = hist + (hist_att @ p["W_ho"].T + p["b_ho"])
    clin_final = clin + (clin_att @ p["W_co"].T + p["b_co"])
    return hist_final, clin_final


def _init_params(key, histology_dim, clinical_dim):
    ks = jax.random.split(key, 12)
    c = COMMON_DIM

    def lin(k, out_d, in_d):
        bound = 1.0 / jnp.sqrt(in_d)
        return jax.random.uniform(k, (out_d, in_d), jnp.float32, -bound, bound)

    return {
        "W_hp": lin(ks[0], c, histology_dim),
        "b_hp": jax.random.uniform(ks[1], (c,), jnp.float32, -0.1, 0.1),
        "W_cp": lin(ks[2], c, clinical_dim),
        "b_cp": jax.random.uniform(ks[3], (c,), jnp.float32, -0.1, 0.1),
        # value slice of MultiheadAttention in_proj (q/k slices are exact no-ops here)
        "W_v":  lin(ks[4], c, c),
        "b_v":  jax.random.uniform(ks[5], (c,), jnp.float32, -0.1, 0.1),
        "W_o":  lin(ks[6], c, c),
        "b_o":  jax.random.uniform(ks[7], (c,), jnp.float32, -0.1, 0.1),
        "W_ho": lin(ks[8], histology_dim, c),
        "b_ho": jax.random.uniform(ks[9], (histology_dim,), jnp.float32, -0.1, 0.1),
        "W_co": lin(ks[10], clinical_dim, c),
        "b_co": jax.random.uniform(ks[11], (clinical_dim,), jnp.float32, -0.1, 0.1),
    }


if __name__ == "__main__":
    B, HIST_DIM, CLIN_DIM = 16, 64, 32   # small demo; TM=8 -> grid of 2 even steps

    key = jax.random.PRNGKey(0)
    k_h, k_c, k_p = jax.random.split(key, 3)

    hist = jax.random.normal(k_h, (B, HIST_DIM), jnp.float32)
    clin = jax.random.normal(k_c, (B, CLIN_DIM), jnp.float32)
    params = _init_params(k_p, HIST_DIM, CLIN_DIM)

    # Fold once (amortized over all calls for static weights).
    folded = fold_params(params, HIST_DIM, CLIN_DIM)
    folded = {k: (jax.block_until_ready(v) if isinstance(v, jax.Array) else v)
              for k, v in folded.items()}

    # Pallas kernel path (forced; the default dispatcher routes batches this small
    # to the equivalent XLA fusion).
    hist_final, clin_final = cross_modal_attention(hist, clin, folded,
                                                   force_pallas=True)
    jax.block_until_ready((hist_final, clin_final))

    ref_h, ref_c = _reference(hist, clin, params)
    assert jnp.allclose(hist_final, ref_h, atol=1e-4, rtol=1e-4)
    assert jnp.allclose(clin_final, ref_c, atol=1e-4, rtol=1e-4)

    # Small-batch XLA dispatch path (same folded affine map) also matches.
    xla_h, xla_c = cross_modal_attention(hist, clin, folded)
    jax.block_until_ready((xla_h, xla_c))
    assert jnp.allclose(xla_h, ref_h, atol=1e-4, rtol=1e-4)
    assert jnp.allclose(xla_c, ref_c, atol=1e-4, rtol=1e-4)

    print("KERNEL_OK")
</pallas_src>

<mosaic_0001>
module attributes {stable_mosaic.version = 11 : i64} {
  func.func @_fused_kernel(%arg0: i32, %arg1: memref<8x64xf32, #tpu.memory_space<vmem>>, %arg2: memref<8x32xf32, #tpu.memory_space<vmem>>, %arg3: memref<32x64xf32, #tpu.memory_space<vmem>>, %arg4: memref<64x32xf32, #tpu.memory_space<vmem>>, %arg5: memref<1x64xf32, #tpu.memory_space<vmem>>, %arg6: memref<1x32xf32, #tpu.memory_space<vmem>>, %arg7: memref<8x64xf32, #tpu.memory_space<vmem>>, %arg8: memref<8x32xf32, #tpu.memory_space<vmem>>) attributes {dimension_semantics = [#tpu.dimension_semantics<parallel>], iteration_bounds = array<i64: 2>, scalar_prefetch = 0 : i64, scratch_operands = 0 : i64, tpu.core_type = #tpu.core_type<tc>, window_params = [{transform_indices = @transform_0, window_bounds = array<i64: 8, 64>}, {transform_indices = @transform_1, window_bounds = array<i64: 8, 32>}, {pipeline_mode = #tpu.pipeline_mode<synchronous>, transform_indices = @transform_2, window_bounds = array<i64: 32, 64>}, {pipeline_mode = #tpu.pipeline_mode<synchronous>, transform_indices = @transform_3, window_bounds = array<i64: 64, 32>}, {pipeline_mode = #tpu.pipeline_mode<synchronous>, transform_indices = @transform_4, window_bounds = array<i64: 1, 64>}, {pipeline_mode = #tpu.pipeline_mode<synchronous>, transform_indices = @transform_5, window_bounds = array<i64: 1, 32>}, {transform_indices = @transform_6, window_bounds = array<i64: 8, 64>}, {transform_indices = @transform_7, window_bounds = array<i64: 8, 32>}]} {
    %c0 = arith.constant 0 : index
    %c0_0 = arith.constant 0 : index
    %0 = vector.load %arg1[%c0, %c0_0] : memref<8x64xf32, #tpu.memory_space<vmem>>, vector<8x64xf32>
    %c0_1 = arith.constant 0 : index
    %c0_2 = arith.constant 0 : index
    %1 = vector.load %arg2[%c0_1, %c0_2] : memref<8x32xf32, #tpu.memory_space<vmem>>, vector<8x32xf32>
    %c0_3 = arith.constant 0 : index
    %c0_4 = arith.constant 0 : index
    %2 = vector.load %arg3[%c0_3, %c0_4] : memref<32x64xf32, #tpu.memory_space<vmem>>, vector<32x64xf32>
    %cst = arith.constant dense<0.000000e+00> : vector<8x64xf32>
    %3 = tpu.matmul %1, %2, %cst {dimension_numbers = #tpu.dot_dimension_numbers<[1], [0], [0], [1], [0, 0, 1, 1], [], []>} : vector<8x32xf32>, vector<32x64xf32>, vector<8x64xf32> -> vector<8x64xf32>
    %4 = arith.addf %0, %3 : vector<8x64xf32>
    %c0_5 = arith.constant 0 : index
    %c0_6 = arith.constant 0 : index
    %5 = vector.load %arg5[%c0_5, %c0_6] : memref<1x64xf32, #tpu.memory_space<vmem>>, vector<1x64xf32>
    %6 = vector.broadcast %5 : vector<1x64xf32> to vector<8x64xf32>
    %7 = arith.addf %4, %6 : vector<8x64xf32>
    %c0_7 = arith.constant 0 : index
    %c0_8 = arith.constant 0 : index
    %8 = vector.load %arg7[%c0_7, %c0_8] : memref<8x64xf32, #tpu.memory_space<vmem>>, vector<8x64xf32>
    tpu.vector_store %arg7[%c0_7, %c0_8], %7 {strides = array<i32>} : memref<8x64xf32, #tpu.memory_space<vmem>>, vector<8x64xf32>,
    %c0_9 = arith.constant 0 : index
    %c0_10 = arith.constant 0 : index
    %9 = vector.load %arg4[%c0_9, %c0_10] : memref<64x32xf32, #tpu.memory_space<vmem>>, vector<64x32xf32>
    %cst_11 = arith.constant dense<0.000000e+00> : vector<8x32xf32>
    %10 = tpu.matmul %0, %9, %cst_11 {dimension_numbers = #tpu.dot_dimension_numbers<[1], [0], [0], [1], [0, 0, 1, 1], [], []>} : vector<8x64xf32>, vector<64x32xf32>, vector<8x32xf32> -> vector<8x32xf32>
    %11 = arith.addf %1, %10 : vector<8x32xf32>
    %c0_12 = arith.constant 0 : index
    %c0_13 = arith.constant 0 : index
    %12 = vector.load %arg6[%c0_12, %c0_13] : memref<1x32xf32, #tpu.memory_space<vmem>>, vector<1x32xf32>
    %13 = vector.broadcast %12 : vector<1x32xf32> to vector<8x32xf32>
    %14 = arith.addf %11, %13 : vector<8x32xf32>
    %c0_14 = arith.constant 0 : index
    %c0_15 = arith.constant 0 : index
    %15 = vector.load %arg8[%c0_14, %c0_15] : memref<8x32xf32, #tpu.memory_space<vmem>>, vector<8x32xf32>
    tpu.vector_store %arg8[%c0_14, %c0_15], %14 {strides = array<i32>} : memref<8x32xf32, #tpu.memory_space<vmem>>, vector<8x32xf32>,
    return
  }
  func.func @transform_0(%arg0: i32) -> (i32, i32) {
    %c0_i32 = arith.constant 0 : i32
    %c0_i32_0 = arith.constant 0 : i32
    return %arg0, %c0_i32 : i32, i32
  }
  func.func @transform_1(%arg0: i32) -> (i32, i32) {
    %c0_i32 = arith.constant 0 : i32
    %c0_i32_0 = arith.constant 0 : i32
    return %arg0, %c0_i32 : i32, i32
  }
  func.func @transform_2(%arg0: i32) -> (i32, i32) {
    %c0_i32 = arith.constant 0 : i32
    %c0_i32_0 = arith.constant 0 : i32
    %c0_i32_1 = arith.constant 0 : i32
    return %c0_i32, %c0_i32_0 : i32, i32
  }
  func.func @transform_3(%arg0: i32) -> (i32, i32) {
    %c0_i32 = arith.constant 0 : i32
    %c0_i32_0 = arith.constant 0 : i32
    %c0_i32_1 = arith.constant 0 : i32
    return %c0_i32, %c0_i32_0 : i32, i32
  }
  func.func @transform_4(%arg0: i32) -> (i32, i32) {
    %c0_i32 = arith.constant 0 : i32
    %c0_i32_0 = arith.constant 0 : i32
    %c0_i32_1 = arith.constant 0 : i32
    return %c0_i32, %c0_i32_0 : i32, i32
  }
  func.func @transform_5(%arg0: i32) -> (i32, i32) {
    %c0_i32 = arith.constant 0 : i32
    %c0_i32_0 = arith.constant 0 : i32
    %c0_i32_1 = arith.constant 0 : i32
    return %c0_i32, %c0_i32_0 : i32, i32
  }
  func.func @transform_6(%arg0: i32) -> (i32, i32) {
    %c0_i32 = arith.constant 0 : i32
    %c0_i32_0 = arith.constant 0 : i32
    return %arg0, %c0_i32 : i32, i32
  }
  func.func @transform_7(%arg0: i32) -> (i32, i32) {
    %c0_i32 = arith.constant 0 : i32
    %c0_i32_0 = arith.constant 0 : i32
    return %arg0, %c0_i32 : i32, i32
  }
}

</mosaic_0001>

<bundles_post_ra>
// kernel: tpu_custom_call.1
= control target key start
LH: loop header
LB: loop body
LE: loop exit
PB: predicated region body
PF: predicated region fallthrough
CT: control target
= control target key end

     0   :  { %s871_s0 = inlined_call_operand.vmem [shape: f32[16,64], index: 0, kind: input, shape index: {}]   ;;  %s872_s1 = inlined_call_operand.vmem [shape: f32[16,32], index: 1, kind: input, shape index: {}]   ;;  %s873_s2 = inlined_call_operand.vmem [shape: f32[32,64], index: 2, kind: input, shape index: {}]   ;;  %s874_s3 = inlined_call_operand.vmem [shape: f32[64,32], index: 3, kind: input, shape index: {}]   ;;  %s875_s4 = inlined_call_operand.vmem [shape: f32[1,64], index: 4, kind: input, shape index: {}]   ;;  %s876_s5 = inlined_call_operand.vmem [shape: f32[1,32], index: 5, kind: input, shape index: {}]   ;;  %s877_s6 = inlined_call_operand.hbm [shape: f32[16,64], index: 6, kind: output, shape index: {0}]   ;;  %s878_s7 = inlined_call_operand.hbm [shape: f32[16,32], index: 7, kind: output, shape index: {1}]  }
   0x1   :  { %880 = sst [smem:[#allocation8_spill]] %s871_s0 }
   0x2   :  { %13 = vsyncpa [#allocation3], 0 }
   0x3   :  { %15 = vsyncpa [#allocation3 + $0x1], 0 }
   0x4   :  { %16 = vsyncpa [#allocation5], 0 }
   0x5   :  { %18 = vsyncpa [#allocation5 + $0x1], 0  ;;  %s715_s24 = smov 0   ;;  %s717_s25 = smov 0  }
   0x6   :  { %s719_s26 = smov 0   ;;  %s721_s27 = smov 0  }
   0x7 LB: > { %s736_s28 = sadd.s32 4294967295, %s673_s27   ;;  %s517_s29 = sadd.s32 4294967294, %s673_s27   ;;  %s673_s27 = sphi %s721_s27, %s888_s27   ;;  %s669_s26 = sphi %s719_s26, %s887_s26   ;;  %s665_s25 = sphi %s717_s25, %s886_s25   ;;  %s661_s24 = sphi %s715_s24, %s885_s24  }
   0x8   : > { %s740_s30 = sadd.s32 1, %s673_s27   ;;  %s167_s8 = sadd.s32 1, %s669_s26 }
   0x9   : > { %s164_s9 = ssub.s32 %s673_s27, %s740_s30  ;;  %p177_p0 = scmp.ne.s32.totalorder %s669_s26, %s665_s25 }
   0xa   : > { %p165_p1 = scmp.eq.s32.totalorder %s164_s9, 0  ;;  %p178_p2 = scmp.eq.s32.totalorder %s736_s28, 1 }
   0xb   : > { %p183_p3 = scmp.ne.s32.totalorder %s665_s25, %s661_s24  ;;  %p184_p4 = scmp.eq.s32.totalorder %s517_s29, 1 }
   0xc   : > { %s751_s10 = scalar_select %p165_p1, %s669_s26, %s167_s8  }
   0xd   : > { %p753_p5 = por %p178_p2, %p177_p0  ;;  %p757_p6 = por %p184_p4, %p183_p3 }
   0xe   : > { %p520_p7 = scmp.ge.s32.totalorder %s673_s27, 1  ;;  %p254_p8 = scmp.lt.s32.totalorder %s673_s27, 3 }
  0x10   : > { %p255_p9 = pnand %p520_p7, %p254_p8 }
  0x11   : > { %p294_p10 = scmp.lt.s32.totalorder (!%p255_p9), %s736_s28, 1  ;;  %s883_s0 = sld [smem:[#allocation8_spill]] (!%p255_p9) }
  0x12   : > { %258 = sbr.rel (%p255_p9) target bundleno = 179 (0xb3), region = 44  ;;  %s810_s18 = sand.u32 (!%p255_p9), 1, %s665_s25  }
  0x13   : > { %s529_s20 = sshll.u32 (!%p255_p9), %s736_s28, 3 }
  0x14   : > { %s394_s22 = scalar_lea.hbm (!%p255_p9), %s877_s6, %s529_s20  ;;  %s408_s16 = scalar_lea.hbm (!%p255_p9), %s878_s7, %s529_s20 }
  0x15   : > { %s398_s13 = sshll.u32 (!%p255_p9), %s394_s22, 4  ;;  %s399_s13 = int_to_ptr.hbm [resolvable:$true] %s398_s13 }
  0x17   : > { %v347_v0 = vld [vmem:[%s874_s3 + $0x38] sm:$0xff]  ;;  %v346_v1 = vld [vmem:[%s874_s3 + $0x30] sm:$0xff]  ;;  %v345_v3 = vld [vmem:[%s874_s3 + $0x28] sm:$0xff]  ;;  %s295_s23 = scalar_select %p294_p10, %s736_s28, 1  ;;  %vm308_vm0 = vcmask 261120   ;;  %vm338_vm1 = vcmask 523264  }
  0x18   : > { %359 = vmatpush.msra.mxu1 %v347_v0  ;;  %v307_v2 = vld [vmem:[%s873_s2 + $0x18] sm:$0xff]  ;;  %v306_v4 = vld [vmem:[%s873_s2 + $0x10] sm:$0xff]  ;;  %v305_v5 = vld [vmem:[%s873_s2 + $0x8] sm:$0xff] }
  0x19   : > { %324 = vmatpush.msra.mxu0 %v307_v2  ;;  %v344_v6 = vld [vmem:[%s874_s3 + $0x20] sm:$0xff]  ;;  %s523_s14 = sshll.u32 %s295_s23, 3  ;;  %v343_v8 = vld [vmem:[%s874_s3 + $0x18] sm:$0xff]  ;;  %v342_v10 = vld [vmem:[%s874_s3 + $0x10] sm:$0xff]  ;;  %s593_s23 = sshra.s32 %s399_s13, 4  ;;  %s594_s23 = int_to_ptr.hbm [resolvable:$true] %s593_s23 }
  0x1a   : > { %360 = vmatpush.msra.mxu1 %v346_v1  ;;  %v304_v7 = vld [vmem:[%s873_s2] sm:$0xff]  ;;  %s301_s19 = scalar_lea.vmem %s872_s1, %s523_s14  ;;  %v341_v11 = vld [vmem:[%s874_s3 + $0x8] sm:$0xff]  ;;  %s297_s15 = scalar_lea.vmem %s883_s0, %s523_s14 }
  0x1b   : > { %325 = vmatpush.msra.mxu0 %v306_v4  ;;  %v303_v9 = vld [vmem:[%s301_s19] sm:$0xff]  ;;  %s879_s19 = sshll.u32 %s810_s18, 3  ;;  %s379_s14 = scalar_lea.sflag [#allocation3], %s810_s18 }
  0x1c   : > { %361 = vmatpush.msra.mxu1 %v345_v3  ;;  %v340_v12 = vld [vmem:[%s874_s3] sm:$0xff]  ;;  %s286_s8 = scalar_lea.vmem [#allocation2], %s879_s19  ;;  %s595_s29 = scalar_lea.hbm %s594_s23, 8 }
  0x1d   : > { %326 = vmatpush.msra.mxu0 %v305_v5  ;;  %v302_v13 = vld [vmem:[%s297_s15] sm:$0xff]  ;;  %s396_s9 = sshll.u32 %s286_s8, 4  ;;  %p596_p11 = scmp.ne.s32.totalorder %s594_s23, %s595_s29  ;;  %s397_s9 = int_to_ptr.vmem [resolvable:$true] %s396_s9 }
  0x1e   : > { %362 = vmatpush.msra.mxu1 %v344_v6  ;;  %v577_v14 = vld [vmem:[%s875_s4] ss:$0 sm:$0xff]  ;;  %s599_s0 = scalar_lea.hbm %s877_s6, 16  ;;  %p600_p0 = scmp.lt.s32.totalorder %s594_s23, %s877_s6 }
  0x1f   : > { %327 = vmatpush.msra.mxu0 %v304_v7  ;;  %v578_v18 = vld [vmem:[%s876_s5] ss:$0 sm:$0xff]  ;;  %p597_p12 = pnand %p596_p11, %p753_p5  ;;  %p601_p1 = scmp.lt.s32.totalorder %s599_s0, %s595_s29 }
  0x20   : > { %363 = vmatpush.msra.mxu1 %v343_v8  ;;  %525 = vmatmul.msk.f32.vlgmr.msra.gmra.mxu0 %vm308_vm0, %v303_v9 }
  0x21   : > { %p598_p13 = pneg %p597_p12  ;;  %p602_p2 = por %p601_p1, %p600_p0 }
  0x22   : > { %364 = vmatpush.msra.mxu1 %v342_v10 }
  0x23   : > { %p603_p3 = pnand %p602_p2, %p598_p13 }
  0x24   : > { %365 = vmatpush.msra.mxu1 %v341_v11 }
  0x26   : > { %366 = vmatpush.msra.mxu1 %v340_v12 }
  0x27   : > { %526 = vmatmul.msk.f32.vlgmr.msra.gmra.mxu1 %vm338_vm1, %v302_v13 }
  0x9d   : > { %v329_v15 = vpop.f32.mrf.mxu0 }
  0x9e   : > { %v332_v16 = vadd.f32 %v329_v15, %v302_v13 }
  0xa0   : > { %v337_v17 = vadd.f32 %v577_v14, %v332_v16 }
  0xa2   : > { %339 = vst.msk [vmem:[%s286_s8] sm:$0xff] %vm338_vm1, %v337_v17 }
  0xa3   : > { %606 = shalt.err (!%p603_p3)
}
  0xa4   : > { %533 = dma.vmem_to_hbm [thread:$0]  (%p753_p5), %s397_s9, 128, %s399_s13, %s379_s14   ;;  %v368_v19 = vpop.f32.mrf.mxu1 }
  0xa5   : > { %s884_s8 = sshll.u32 %s810_s18, 3  ;;  %s412_s19 = sshll.u32 %s408_s16, 4  ;;  %v371_v20 = vadd.f32 %v368_v19, %v303_v9  ;;  %s413_s19 = int_to_ptr.hbm [resolvable:$true] %s412_s19 }
  0xa6   : > { %s293_s28 = scalar_lea.vmem [#allocation4], %s884_s8  ;;  %s384_s0 = scalar_lea.sflag [#allocation5], %s810_s18 }
  0xa7   : > { %s410_s17 = sshll.u32 %s293_s28, 4  ;;  %v376_v21 = vadd.f32 %v578_v18, %v371_v20  ;;  %s621_s21 = sshra.s32 %s413_s19, 4  ;;  %s411_s17 = int_to_ptr.vmem [resolvable:$true] %s410_s17  ;;  %s622_s21 = int_to_ptr.hbm [resolvable:$true] %s621_s21 }
  0xa8   : > { %s623_s23 = scalar_lea.hbm %s622_s21, 8  ;;  %s627_s14 = scalar_lea.hbm %s878_s7, 16 }
  0xa9   : > { %377 = vst.msk [vmem:[%s293_s28] sm:$0xff] %vm308_vm0, %v376_v21  ;;  %p624_p4 = scmp.ne.s32.totalorder %s622_s21, %s623_s23  ;;  %p628_p9 = scmp.lt.s32.totalorder %s622_s21, %s878_s7 }
  0xaa   : > { %p629_p10 = scmp.lt.s32.totalorder %s627_s14, %s623_s23 }
  0xab   : > { %p625_p7 = pnand %p624_p4, %p753_p5 }
  0xac   : > { %p630_p11 = por %p629_p10, %p628_p9 }
  0xad   : > { %p626_p8 = pneg %p625_p7 }
  0xaf   : > { %p631_p12 = pnand %p630_p11, %p626_p8 }
  0xb1   : > { %634 = shalt.err (!%p631_p12)
}
  0xb2   : > { %534 = dma.vmem_to_hbm [thread:$0]  (%p753_p5), %s411_s17, 128, %s413_s19, %s384_s0  }
  0xb3 PF: > { %p544_p13 = scmp.ge.s32.totalorder %s673_s27, 2  ;;  %s424_s18 = sand.u32 1, %s661_s24  }
  0xb4   : > { %s425_s22 = scalar_lea.sflag [#allocation3], %s424_s18 }
  0xb5   : > { %p538_p0 = pnand %p544_p13, %p757_p6 }
  0xb7   : > { %p539_p1 = pneg %p538_p0 }
  0xb9   : > { %652 = dma.done.wait (%p539_p1), %s425_s22, 128  }
  0xba   : > { %654 = vsyncadd (%p539_p1), %s425_s22, 4294967168  ;;  %s435_s15 = scalar_lea.sflag [#allocation5], %s424_s18 }
  0xbb   : > { %656 = dma.done.wait (%p539_p1), %s435_s15, 128  }
  0xbc   : > { %658 = vsyncadd (%p539_p1), %s435_s15, 4294967168  ;;  %p21_p5 = scmp.ge.s32.totalorder %s740_s30, 4   ;;  %s885_s24 = smov %s665_s25 }
  0xbd   : > { %s886_s25 = smov %s669_s26  ;;  %s887_s26 = smov %s751_s10 }
  0xbe   : > { %s888_s27 = smov %s740_s30  ;;  %23 = sbr.rel (!%p21_p5) target bundleno = 7 (0x7), region = 99 }
  0xc3   :  { %441 = vsyncpa [#allocation3], 1 }
  0xc4   :  { %443 = vsyncpa [#allocation3 + $0x1], 1 }
  0xc5   :  { %444 = vsyncpa [#allocation5], 1 }
  0xc6   :  { %446 = vsyncpa [#allocation5 + $0x1], 1 }

</bundles_post_ra>
